<compile_context>
chip_gen: v7x
topology: tpu7x:2x2x1
jax: 0.10.0
libtpu: 0.0.40
codegen_flags: <defaults>
</compile_context>

<pallas_src>
import jax
import jax.numpy as jnp
from jax.experimental import pallas as pl
from jax.experimental.pallas import tpu as pltpu

LANES = 128
DEFAULT_TILE_ROWS = 1024  # 1024x128 f32 = 512 KiB per input per buffer.
_PAD_LOGIT = -1e30        # stable BCE of this logit with target 0 is exactly 0.


def _round_up(x: int, m: int) -> int:
    return ((x + m - 1) // m) * m


def _cdiv(a: int, b: int) -> int:
    return -(-a // b)


def _wbce_kernel(x_ref, t_ref, out_ref, acc_ref):
    i = pl.program_id(1)

    # Zero the per-core accumulator at the start of each split's reduction.
    @pl.when(i == 0)
    def _():
        acc_ref[...] = jnp.zeros_like(acc_ref)

    x = x_ref[...].astype(jnp.float32)
    t = t_ref[...].astype(jnp.float32)

    # Numerically stable BCE with logits:
    #   l(x, t) = max(x, 0) - x*t + log(1 + exp(-|x|))
    bce = jnp.maximum(x, 0.0) - x * t + jnp.log1p(jnp.exp(-jnp.abs(x)))
    pos = jnp.where(t == 1.0, bce, 0.0)

    tr = x.shape[0]

    def fold(v):
        # (tr, 128) -> (tr//8, 8, 128) keeps every (8,128) vreg tile intact, so
        # the sum over axis 0 lowers to pure elementwise vreg adds (VPU only).
        return jnp.sum(v.reshape(tr // 8, 8, LANES), axis=0)

    acc_ref[0] += fold(bce)
    acc_ref[1] += fold(pos)
    acc_ref[2] += fold(t)

    # One lane-dense, unmasked (3, 8, 128) store per split, at the end.
    @pl.when(i == pl.num_programs(1) - 1)
    def _():
        out_ref[...] = acc_ref[...]


def weighted_bce_with_logits_loss(
    inputs: jax.Array, targets: jax.Array, *, tile_rows: int = DEFAULT_TILE_ROWS
) -> jax.Array:
    """Matches WeightedBCEWithLogitsLoss.forward (mean-reduced weighted BCE)."""
    assert inputs.shape == targets.shape
    numel = int(inputs.size)
    assert numel > 0

    # Tiling: shrink the tile for tiny inputs, cap at tile_rows for big ones.
    rows_needed = _cdiv(numel, LANES)
    tr = max(8, min(int(tile_rows), _round_up(rows_needed, 8)))
    tr = _round_up(tr, 8)  # fold() needs tr % 8 == 0
    tiles_needed = _cdiv(rows_needed, tr)
    # Two-way split across the "parallel" grid axis (uses both TCs on v7x).
    nsplit = 2 if tiles_needed >= 2 else 1
    inner = _cdiv(tiles_needed, nsplit)
    rows_padded = nsplit * inner * tr
    padded_numel = rows_padded * LANES

    x_flat = inputs.reshape(-1)
    t_flat = targets.reshape(-1)
    pad = padded_numel - numel
    if pad:
        # Padded logits of -1e30 with target 0 contribute exactly 0 to every
        # accumulator, so the tail needs no in-kernel mask.
        x_flat = jnp.pad(x_flat, (0, pad), constant_values=_PAD_LOGIT)
        t_flat = jnp.pad(t_flat, (0, pad), constant_values=0.0)

    x2d = x_flat.reshape(rows_padded, LANES)
    t2d = t_flat.reshape(rows_padded, LANES)

    in_spec = pl.BlockSpec((tr, LANES), lambda s, i: (s * inner + i, 0))
    out_spec = pl.BlockSpec((3, 8, LANES), lambda s, i: (s, 0, 0))

    partials = pl.pallas_call(
        _wbce_kernel,
        out_shape=jax.ShapeDtypeStruct((nsplit * 3, 8, LANES), jnp.float32),
        grid_spec=pltpu.PrefetchScalarGridSpec(
            num_scalar_prefetch=0,
            grid=(nsplit, inner),
            in_specs=[in_spec, in_spec],
            out_specs=out_spec,
            scratch_shapes=[
                # [0]=total bce, [1]=positive bce, [2]=target sum.
                pltpu.VMEM((3, 8, LANES), jnp.float32),
            ],
        ),
        compiler_params=pltpu.CompilerParams(
            dimension_semantics=("parallel", "arbitrary"),
        ),
    )(x2d, t2d)

    # Tiny final reduction over (nsplit, 3, 8, 128) partials, done by XLA.
    sums = jnp.sum(partials.reshape(nsplit, 3, 8, LANES), axis=(0, 2, 3))
    total_sum, pos_sum, pos_count = sums[0], sums[1], sums[2]

    total = jnp.float32(numel)
    neg_sum = total_sum - pos_sum
    neg_count = total - pos_count
    # Note: if there are no positive (or no negative) targets, beta_p / beta_n is
    # inf, same as the PyTorch reference.
    beta_p = total / pos_count
    beta_n = total / neg_count
    return (beta_p * pos_sum + beta_n * neg_sum) / total


def _reference_loss(inputs, targets):
    """Pure-JAX reference mirroring the PyTorch module."""
    x = inputs.astype(jnp.float32)
    t = targets.astype(jnp.float32)
    pos_count = t.sum()
    neg_count = t.size - pos_count
    beta_p = (pos_count + neg_count) / pos_count
    beta_n = (pos_count + neg_count) / neg_count
    weights = jnp.where(t == 1, beta_p, beta_n)
    bce = jnp.maximum(x, 0.0) - x * t + jnp.log1p(jnp.exp(-jnp.abs(x)))
    return jnp.mean(weights * bce)


if __name__ == "__main__":
    key = jax.random.PRNGKey(0)

    def _make(shape, k):
        k_x, k_t = jax.random.split(k)
        x = jax.random.normal(k_x, shape, dtype=jnp.float32)
        t = jax.random.bernoulli(k_t, p=0.3, shape=shape).astype(jnp.float32)
        return x, t

    # Case 1: small NCHW segmentation-style shape, default tiling (single tile).
    k1, k2 = jax.random.split(key)
    x1, t1 = _make((2, 4, 16, 16), k1)
    loss1 = jax.block_until_ready(weighted_bce_with_logits_loss(x1, t1))
    ref1 = _reference_loss(x1, t1)
    assert jnp.allclose(loss1, ref1, rtol=1e-5, atol=1e-5), (loss1, ref1)

    # Case 2: same data, tiny tiles -> exercises multi-tile + 2-way split path.
    loss2 = jax.block_until_ready(
        weighted_bce_with_logits_loss(x1, t1, tile_rows=8)
    )
    assert jnp.allclose(loss2, ref1, rtol=1e-5, atol=1e-5), (loss2, ref1)

    # Case 3: odd numel -> exercises the padding path.
    x3, t3 = _make((2, 3, 17, 19), k2)
    loss3 = jax.block_until_ready(
        weighted_bce_with_logits_loss(x3, t3, tile_rows=8)
    )
    ref3 = _reference_loss(x3, t3)
    assert jnp.allclose(loss3, ref3, rtol=1e-5, atol=1e-5), (loss3, ref3)

    print("KERNEL_OK")
</pallas_src>

<mosaic_0001>
module attributes {stable_mosaic.version = 11 : i64} {
  func.func @_wbce_kernel(%arg0: i32, %arg1: i32, %arg2: memref<16x128xf32, #tpu.memory_space<vmem>>, %arg3: memref<16x128xf32, #tpu.memory_space<vmem>>, %arg4: memref<3x8x128xf32, #tpu.memory_space<vmem>>, %arg5: memref<3x8x128xf32, #tpu.memory_space<vmem>>) attributes {dimension_semantics = [#tpu.dimension_semantics<parallel>, #tpu.dimension_semantics<arbitrary>], iteration_bounds = array<i64: 1, 1>, scalar_prefetch = 0 : i64, scratch_operands = 1 : i64, tpu.core_type = #tpu.core_type<tc>, window_params = [{transform_indices = @transform_0, window_bounds = array<i64: 16, 128>}, {transform_indices = @transform_1, window_bounds = array<i64: 16, 128>}, {transform_indices = @transform_2, window_bounds = array<i64: 3, 8, 128>}]} {
    %c0_i32 = arith.constant 0 : i32
    %0 = arith.cmpi eq, %arg1, %c0_i32 : i32
    %1 = arith.extui %0 : i1 to i32
    %c0_i32_0 = arith.constant 0 : i32
    %2 = arith.cmpi ne, %1, %c0_i32_0 : i32
    scf.if %2 {
      %cst_28 = arith.constant 0.000000e+00 : f32
      %46 = vector.broadcast %cst_28 : f32 to vector<3x8x128xf32>
      %c0_29 = arith.constant 0 : index
      %c0_30 = arith.constant 0 : index
      %c0_31 = arith.constant 0 : index
      %47 = vector.load %arg5[%c0_29, %c0_30, %c0_31] : memref<3x8x128xf32, #tpu.memory_space<vmem>>, vector<3x8x128xf32>
      tpu.vector_store %arg5[%c0_29, %c0_30, %c0_31], %46 {strides = array<i32>} : memref<3x8x128xf32, #tpu.memory_space<vmem>>, vector<3x8x128xf32>,
    } else {
    }
    %c0 = arith.constant 0 : index
    %c0_1 = arith.constant 0 : index
    %3 = vector.load %arg2[%c0, %c0_1] : memref<16x128xf32, #tpu.memory_space<vmem>>, vector<16x128xf32>
    %c0_2 = arith.constant 0 : index
    %c0_3 = arith.constant 0 : index
    %4 = vector.load %arg3[%c0_2, %c0_3] : memref<16x128xf32, #tpu.memory_space<vmem>>, vector<16x128xf32>
    %cst = arith.constant 0.000000e+00 : f32
    %5 = vector.broadcast %cst : f32 to vector<16x128xf32>
    %6 = arith.maximumf %3, %5 : vector<16x128xf32>
    %7 = arith.mulf %3, %4 : vector<16x128xf32>
    %8 = arith.subf %6, %7 : vector<16x128xf32>
    %9 = math.absf %3 : vector<16x128xf32>
    %cst_4 = arith.constant 0.000000e+00 : f32
    %10 = vector.broadcast %cst_4 : f32 to vector<16x128xf32>
    %11 = arith.subf %10, %9 : vector<16x128xf32>
    %12 = math.exp %11 : vector<16x128xf32>
    %13 = math.log1p %12 : vector<16x128xf32>
    %14 = arith.addf %8, %13 : vector<16x128xf32>
    %cst_5 = arith.constant 1.000000e+00 : f32
    %15 = vector.broadcast %cst_5 : f32 to vector<16x128xf32>
    %16 = arith.cmpf oeq, %4, %15 : vector<16x128xf32>
    %cst_6 = arith.constant 0.000000e+00 : f32
    %17 = vector.broadcast %cst_6 : f32 to vector<16x128xf32>
    %18 = arith.select %16, %14, %17 : vector<16x128xi1>, vector<16x128xf32>
    %c0_7 = arith.constant 0 : index
    %c0_8 = arith.constant 0 : index
    %c0_9 = arith.constant 0 : index
    %19 = vector.load %arg5[%c0_7, %c0_8, %c0_9] : memref<3x8x128xf32, #tpu.memory_space<vmem>>, vector<1x8x128xf32>
    %20 = vector.shape_cast %19 : vector<1x8x128xf32> to vector<8x128xf32>
    %21 = vector.shape_cast %14 : vector<16x128xf32> to vector<2x8x128xf32>
    %cst_10 = arith.constant dense<0.000000e+00> : vector<8x128xf32>
    %22 = vector.multi_reduction <add>, %21, %cst_10 [0] : vector<2x8x128xf32> to vector<8x128xf32>
    %23 = arith.addf %20, %22 : vector<8x128xf32>
    %c0_11 = arith.constant 0 : index
    %c0_12 = arith.constant 0 : index
    %c0_13 = arith.constant 0 : index
    %24 = vector.load %arg5[%c0_11, %c0_12, %c0_13] : memref<3x8x128xf32, #tpu.memory_space<vmem>>, vector<1x8x128xf32>
    %25 = vector.shape_cast %24 : vector<1x8x128xf32> to vector<8x128xf32>
    %26 = vector.shape_cast %23 : vector<8x128xf32> to vector<1x8x128xf32>
    tpu.vector_store %arg5[%c0_11, %c0_12, %c0_13], %26 {strides = array<i32>} : memref<3x8x128xf32, #tpu.memory_space<vmem>>, vector<1x8x128xf32>,
    %c1 = arith.constant 1 : index
    %c0_14 = arith.constant 0 : index
    %c0_15 = arith.constant 0 : index
    %27 = vector.load %arg5[%c1, %c0_14, %c0_15] : memref<3x8x128xf32, #tpu.memory_space<vmem>>, vector<1x8x128xf32>
    %28 = vector.shape_cast %27 : vector<1x8x128xf32> to vector<8x128xf32>
    %29 = vector.shape_cast %18 : vector<16x128xf32> to vector<2x8x128xf32>
    %cst_16 = arith.constant dense<0.000000e+00> : vector<8x128xf32>
    %30 = vector.multi_reduction <add>, %29, %cst_16 [0] : vector<2x8x128xf32> to vector<8x128xf32>
    %31 = arith.addf %28, %30 : vector<8x128xf32>
    %c1_17 = arith.constant 1 : index
    %c0_18 = arith.constant 0 : index
    %c0_19 = arith.constant 0 : index
    %32 = vector.load %arg5[%c1_17, %c0_18, %c0_19] : memref<3x8x128xf32, #tpu.memory_space<vmem>>, vector<1x8x128xf32>
    %33 = vector.shape_cast %32 : vector<1x8x128xf32> to vector<8x128xf32>
    %34 = vector.shape_cast %31 : vector<8x128xf32> to vector<1x8x128xf32>
    tpu.vector_store %arg5[%c1_17, %c0_18, %c0_19], %34 {strides = array<i32>} : memref<3x8x128xf32, #tpu.memory_space<vmem>>, vector<1x8x128xf32>,
    %c2 = arith.constant 2 : index
    %c0_20 = arith.constant 0 : index
    %c0_21 = arith.constant 0 : index
    %35 = vector.load %arg5[%c2, %c0_20, %c0_21] : memref<3x8x128xf32, #tpu.memory_space<vmem>>, vector<1x8x128xf32>
    %36 = vector.shape_cast %35 : vector<1x8x128xf32> to vector<8x128xf32>
    %37 = vector.shape_cast %4 : vector<16x128xf32> to vector<2x8x128xf32>
    %cst_22 = arith.constant dense<0.000000e+00> : vector<8x128xf32>
    %38 = vector.multi_reduction <add>, %37, %cst_22 [0] : vector<2x8x128xf32> to vector<8x128xf32>
    %39 = arith.addf %36, %38 : vector<8x128xf32>
    %c2_23 = arith.constant 2 : index
    %c0_24 = arith.constant 0 : index
    %c0_25 = arith.constant 0 : index
    %40 = vector.load %arg5[%c2_23, %c0_24, %c0_25] : memref<3x8x128xf32, #tpu.memory_space<vmem>>, vector<1x8x128xf32>
    %41 = vector.shape_cast %40 : vector<1x8x128xf32> to vector<8x128xf32>
    %42 = vector.shape_cast %39 : vector<8x128xf32> to vector<1x8x128xf32>
    tpu.vector_store %arg5[%c2_23, %c0_24, %c0_25], %42 {strides = array<i32>} : memref<3x8x128xf32, #tpu.memory_space<vmem>>, vector<1x8x128xf32>,
    %c0_i32_26 = arith.constant 0 : i32
    %43 = arith.cmpi eq, %arg1, %c0_i32_26 : i32
    %44 = arith.extui %43 : i1 to i32
    %c0_i32_27 = arith.constant 0 : i32
    %45 = arith.cmpi ne, %44, %c0_i32_27 : i32
    scf.if %45 {
      %c0_28 = arith.constant 0 : index
      %c0_29 = arith.constant 0 : index
      %c0_30 = arith.constant 0 : index
      %46 = vector.load %arg5[%c0_28, %c0_29, %c0_30] : memref<3x8x128xf32, #tpu.memory_space<vmem>>, vector<3x8x128xf32>
      %c0_31 = arith.constant 0 : index
      %c0_32 = arith.constant 0 : index
      %c0_33 = arith.constant 0 : index
      %47 = vector.load %arg4[%c0_31, %c0_32, %c0_33] : memref<3x8x128xf32, #tpu.memory_space<vmem>>, vector<3x8x128xf32>
      tpu.vector_store %arg4[%c0_31, %c0_32, %c0_33], %46 {strides = array<i32>} : memref<3x8x128xf32, #tpu.memory_space<vmem>>, vector<3x8x128xf32>,
    } else {
    }
    return
  }
  func.func @transform_0(%arg0: i32, %arg1: i32) -> (i32, i32) {
    %c1_i32 = arith.constant 1 : i32
    %0 = arith.muli %arg0, %c1_i32 : i32
    %1 = arith.addi %0, %arg1 : i32
    %c0_i32 = arith.constant 0 : i32
    %c0_i32_0 = arith.constant 0 : i32
    return %1, %c0_i32 : i32, i32
  }
  func.func @transform_1(%arg0: i32, %arg1: i32) -> (i32, i32) {
    %c1_i32 = arith.constant 1 : i32
    %0 = arith.muli %arg0, %c1_i32 : i32
    %1 = arith.addi %0, %arg1 : i32
    %c0_i32 = arith.constant 0 : i32
    %c0_i32_0 = arith.constant 0 : i32
    return %1, %c0_i32 : i32, i32
  }
  func.func @transform_2(%arg0: i32, %arg1: i32) -> (i32, i32, i32) {
    %c0_i32 = arith.constant 0 : i32
    %c0_i32_0 = arith.constant 0 : i32
    %c0_i32_1 = arith.constant 0 : i32
    return %arg0, %c0_i32, %c0_i32_0 : i32, i32, i32
  }
}

</mosaic_0001>

<bundles_post_ra>
// kernel: tpu_custom_call.1
= control target key start
LH: loop header
LB: loop body
LE: loop exit
PB: predicated region body
PF: predicated region fallthrough
CT: control target
= control target key end

     0   :  { %7 = vsyncpa [#allocation4], 0  ;;  %s292_s0 = inlined_call_operand.hbm [shape: f32[16,128], index: 0, kind: input, shape index: {}]   ;;  %s293_s1 = inlined_call_operand.hbm [shape: f32[16,128], index: 1, kind: input, shape index: {}]   ;;  %s294_s2 = inlined_call_operand.hbm [shape: f32[3,8,128], index: 2, kind: output, shape index: {}]  }
   0x1   :  { %8 = vsyncpa [#allocation7], 0 }
   0x2   :  { %9 = vsyncpa [#allocation5], 0  ;;  %s227_s9 = smov [#allocation3]   ;;  %s155_s13 = scalar_lea.hbm %s292_s0, 256 }
   0x3   :  { %s19_s10 = sshll.u32 %s227_s9, 4  ;;  %p156_p0 = scmp.ne.s32.totalorder %s292_s0, %s155_s13  ;;  %s20_s10 = int_to_ptr.vmem [resolvable:$true] %s19_s10 }
   0x4   :  { %p159_p1 = scmp.lt.u32.totalorder %s155_s13, %s292_s0 }
   0x6   :  { %p161_p2 = pnand %p159_p1, %p156_p0 }
   0x8   :  { %164 = shalt.err (!%p161_p2)
}
   0x9   :  { %s165_s18 = scalar_lea.vmem %s20_s10, 256  ;;  %p170_p4 = scmp.lt.s32.totalorder %s20_s10, %s20_s10 }
   0xa   :  { %p166_p3 = scmp.ne.s32.totalorder %s20_s10, %s165_s18  ;;  %p171_p5 = scmp.lt.s32.totalorder %s165_s18, %s165_s18 }
   0xc   :  { %p172_p6 = por %p171_p5, %p170_p4 }
   0xe   :  { %p173_p7 = pnand %p172_p6, %p166_p3 }
  0x10   :  { %176 = shalt.err (!%p173_p7)
}
  0x11   :  { %s228_s19 = smov 128   ;;  %s229_s20 = smov 8  }
  0x12   :  { %25 = dma.hbm_to_vmem [thread:$0]  %s292_s0, 256, %s20_s10, [#allocation4], %s228_s19, %s228_s19, %s229_s20  }
  0x13   :  { %s230_s23 = smov [#allocation6]   ;;  %s177_s27 = scalar_lea.hbm %s293_s1, 256 }
  0x14   :  { %s35_s24 = sshll.u32 %s230_s23, 4  ;;  %p178_p8 = scmp.ne.s32.totalorder %s293_s1, %s177_s27  ;;  %s36_s24 = int_to_ptr.vmem [resolvable:$true] %s35_s24 }
  0x15   :  { %p181_p9 = scmp.lt.u32.totalorder %s177_s27, %s293_s1 }
  0x17   :  { %p183_p10 = pnand %p181_p9, %p178_p8 }
  0x19   :  { %186 = shalt.err (!%p183_p10)
}
  0x1a   :  { %s187_s4 = scalar_lea.vmem %s36_s24, 256  ;;  %p192_p12 = scmp.lt.s32.totalorder %s36_s24, %s36_s24 }
  0x1b   :  { %p188_p11 = scmp.ne.s32.totalorder %s36_s24, %s187_s4  ;;  %p193_p13 = scmp.lt.s32.totalorder %s187_s4, %s187_s4 }
  0x1d   :  { %p194_p0 = por %p193_p13, %p192_p12 }
  0x1f   :  { %p195_p1 = pnand %p194_p0, %p188_p11 }
  0x21   :  { %198 = shalt.err (!%p195_p1)
}
  0x22   :  { %41 = dma.hbm_to_vmem [thread:$0]  %s293_s1, 256, %s36_s24, [#allocation7], %s228_s19, %s228_s19, %s229_s20  }
  0x23   :  { %221 = dma.done.wait [#allocation4], 256  }
  0x24   :  { %222 = vsyncadd [#allocation4], 4294967040 }
  0x25   :  { %223 = dma.done.wait [#allocation7], 256  }
  0x26   :  { %224 = vsyncadd [#allocation7], 4294967040  ;;  %v59_v0 = vld [vmem:[#allocation3] sm:$0xff]  ;;  %v60_v1 = vld [vmem:[#allocation3 + $0x8] sm:$0xff]  ;;  %s231_s1 = smov [#allocation8]  }
  0x27   :  { %v69_v2 = vand.u32 2147483647, %v59_v0  ;;  %v61_v3 = vld [vmem:[#allocation6] sm:$0xff]  ;;  %v62_v4 = vld [vmem:[#allocation6 + $0x8] sm:$0xff]  ;;  %v70_v5 = vand.u32 2147483647, %v60_v1 }
  0x28   :  { %v112_v7 = vadd.f32 %v62_v4, %v61_v3  ;;  %v63_v18 = vmax.f32 %v59_v0, 0.0  ;;  %v65_v19 = vmul.f32 %v61_v3, %v59_v0  ;;  %v64_v22 = vmax.f32 %v60_v1, 0.0  ;;  %s129_s6 = sshll.u32 %s231_s1, 4  ;;  %s130_s6 = int_to_ptr.vmem [resolvable:$true] %s129_s6 }
  0x29   :  { %v71_v6 = vsub.f32 0.0, %v69_v2  ;;  %v72_v8 = vsub.f32 0.0, %v70_v5  ;;  %v66_v23 = vmul.f32 %v62_v4, %v60_v1  ;;  %vm97_vm2 = vcmp.eq.f32.partialorder %v61_v3, 1.0  ;;  %s199_s7 = scalar_lea.vmem %s130_s6, 384  ;;  %p204_p3 = scmp.lt.s32.totalorder %s130_s6, %s130_s6 }
  0x2a   :  { %123 = vst [vmem:[#allocation8 + $0x10] sm:$0xff] %v112_v7  ;;  %v67_v27 = vsub.f32 %v63_v18, %v65_v19  ;;  %vm98_vm3 = vcmp.eq.f32.partialorder %v62_v4, 1.0  ;;  %p200_p2 = scmp.ne.s32.totalorder %s130_s6, %s199_s7  ;;  %p205_p4 = scmp.lt.s32.totalorder %s199_s7, %s199_s7 }
  0x2b   :  { %v73_v9 = vmul.f32 1.442695, %v71_v6  ;;  %v75_v10 = vmul.f32 1.442695, %v72_v8  ;;  %v68_v30 = vsub.f32 %v64_v22, %v66_v23 }
  0x2c   :  { %p206_p5 = por %p205_p4, %p204_p3 }
  0x2d   :  { %147 = vpow2.f32 %v73_v9 }
  0x2e   :  { %149 = vpow2.f32 %v75_v10  ;;  %p207_p6 = pnand %p206_p5, %p200_p2 }
  0x37   :  { %v148_v11 = vpop.eup %147 }
  0x38   :  { %v150_v12 = vpop.eup %149  ;;  %v77_v13 = vadd.f32 1.0, %v148_v11  ;;  %v80_v15 = vmul.f32 -0.5, %v148_v11  ;;  %v83_v20 = vand.u32 2147483647, %v148_v11 }
  0x39   :  { %v86_v14 = vadd.f32 1.0, %v150_v12  ;;  %v89_v16 = vmul.f32 -0.5, %v150_v12  ;;  %v92_v24 = vand.u32 2147483647, %v150_v12 }
  0x3a   :  { %151 = vlog2.f32 %v77_v13  ;;  %v81_v17 = vadd.f32 1.0, %v80_v15  ;;  %vm84_vm0 = vcmp.lt.f32.partialorder %v83_v20, 0.0004427343 }
  0x3b   :  { %153 = vlog2.f32 %v86_v14  ;;  %v90_v21 = vadd.f32 1.0, %v89_v16  ;;  %vm93_vm1 = vcmp.lt.f32.partialorder %v92_v24, 0.0004427343 }
  0x3c   :  { %v82_v25 = vmul.f32 %v148_v11, %v81_v17 }
  0x3d   :  { %v91_v28 = vmul.f32 %v150_v12, %v90_v21 }
  0x44   :  { %v152_v26 = vpop.eup %151 }
  0x45   :  { %v154_v29 = vpop.eup %153  ;;  %v79_v31 = vmul.f32 0.6931472, %v152_v26 }
  0x46   :  { %v88_v32 = vmul.f32 0.6931472, %v154_v29 }
  0x47   :  { %v85_v33 = vsel %vm84_vm0, %v82_v25, %v79_v31 }
  0x48   :  { %v94_v34 = vsel %vm93_vm1, %v91_v28, %v88_v32  ;;  %v95_v35 = vadd.f32 %v85_v33, %v67_v27 }
  0x49   :  { %v96_v36 = vadd.f32 %v94_v34, %v68_v30 }
  0x4a   :  { %v99_v37 = vsel %vm97_vm2, %v95_v35, 0.0 }
  0x4b   :  { %v102_v38 = vadd.f32 %v96_v36, %v95_v35  ;;  %v100_v39 = vsel %vm98_vm3, %v96_v36, 0.0 }
  0x4c   :  { %v107_v40 = vadd.f32 %v100_v39, %v99_v37 }
  0x4d   :  { %121 = vst [vmem:[#allocation8] sm:$0xff] %v102_v38 }
  0x4e   :  { %122 = vst [vmem:[#allocation8 + $0x8] sm:$0xff] %v107_v40 }
  0x4f   :  { %210 = shalt.err (!%p207_p6)
}
  0x50   :  { %s211_s10 = scalar_lea.hbm %s294_s2, 384 }
  0x51   :  { %p212_p7 = scmp.ne.s32.totalorder %s294_s2, %s211_s10  ;;  %p215_p8 = scmp.lt.u32.totalorder %s211_s10, %s294_s2 }
  0x53   :  { %p217_p9 = pnand %p215_p8, %p212_p7 }
  0x55   :  { %220 = shalt.err (!%p217_p9)
}
  0x56   :  { %135 = dma.vmem_to_hbm [thread:$0]  %s130_s6, 384, %s294_s2, [#allocation5], %s228_s19, %s228_s19, %s229_s20  }
  0x57   :  { %225 = dma.done.wait [#allocation5], 384  }
  0x58   :  { %226 = vsyncadd [#allocation5], 4294966912 }
  0x59   :  { %139 = vsyncpa [#allocation4], 1 }
  0x5a   :  { %140 = vsyncpa [#allocation7], 1 }
  0x5b   :  { %141 = vsyncpa [#allocation5], 1 }

</bundles_post_ra>
